<compile_context>
chip_gen: v6e
topology: v6e:2x2x1
jax: 0.10.0
libtpu: 0.0.40
codegen_flags: <defaults>
</compile_context>

<pallas_src>
import functools

import jax
import jax.numpy as jnp
from jax.experimental import pallas as pl
from jax.experimental.pallas import tpu as pltpu

CLASSES_CNT = 205
INTERNAL_FEATURES = 1024
BN_EPS = 1e-5
NEG_BF16 = float(jnp.finfo(jnp.bfloat16).min)


def round_up(x, m):
    return (x + m - 1) // m * m


# ----------------------------------------------------------------------------
# Pallas kernels
# ----------------------------------------------------------------------------
def matmul_kernel(*refs, apply_relu, has_res):
    """bf16 (tm,tk) @ (tk,tn) -> f32 acc; epilogue: +bias (+residual) (+ReLU)."""
    a_ref, b_ref, bias_ref = refs[:3]
    res_ref = refs[3] if has_res else None
    o_ref, acc_ref = refs[-2], refs[-1]
    k = pl.program_id(2)

    @pl.when(k == 0)
    def _():
        acc_ref[...] = jnp.zeros_like(acc_ref)

    acc_ref[...] += jnp.dot(a_ref[...], b_ref[...],
                            preferred_element_type=jnp.float32)

    @pl.when(k == pl.num_programs(2) - 1)
    def _():
        y = acc_ref[...] + bias_ref[...]
        if has_res:
            y = y + res_ref[...].astype(jnp.float32)
        if apply_relu:
            y = jnp.maximum(y, 0.0)
        o_ref[...] = y.astype(o_ref.dtype)


def max3_kernel(x_ref, o_ref):
    # x_ref: (3, BR, 128) -> elementwise max over the 3 taps.
    o_ref[...] = jnp.maximum(jnp.maximum(x_ref[0], x_ref[1]), x_ref[2])


# ----------------------------------------------------------------------------
# Pallas wrappers
# ----------------------------------------------------------------------------
def matmul_bias_act(a, prep, relu, residual=None, out_dtype=jnp.bfloat16):
    """(M,K) @ prepared-(Kp,Np) bf16 weights + bias[N] (+residual) (+ReLU)."""
    M, K = a.shape
    wp, bp = prep["w"], prep["b"]
    Kp, Np = wp.shape
    tn = prep["tn"]
    Cout = prep["Cout"]

    tm = min(256, round_up(M, 8))
    Mp = round_up(M, tm)
    tk = next(t for t in (512, 384, 256, 128) if Kp % t == 0)

    a_p = jnp.pad(a.astype(jnp.bfloat16), ((0, Mp - M), (0, Kp - K)))

    in_specs = [
        pl.BlockSpec((tm, tk), lambda i, j, k: (i, k)),
        pl.BlockSpec((tk, tn), lambda i, j, k: (k, j)),
        pl.BlockSpec((1, tn), lambda i, j, k: (0, j)),
    ]
    inputs = [a_p, wp, bp]

    has_res = residual is not None
    if has_res:
        r_p = jnp.pad(residual.astype(jnp.bfloat16),
                      ((0, Mp - M), (0, Np - Cout)))
        in_specs.append(pl.BlockSpec((tm, tn), lambda i, j, k: (i, j)))
        inputs.append(r_p)

    kern = functools.partial(matmul_kernel, apply_relu=relu, has_res=has_res)
    grid = (Mp // tm, Np // tn, Kp // tk)

    out = pl.pallas_call(
        kern,
        out_shape=jax.ShapeDtypeStruct((Mp, Np), out_dtype),
        grid_spec=pltpu.PrefetchScalarGridSpec(
            num_scalar_prefetch=0,
            grid=grid,
            in_specs=in_specs,
            out_specs=pl.BlockSpec((tm, tn), lambda i, j, k: (i, j)),
            scratch_shapes=[pltpu.VMEM((tm, tn), jnp.float32)],
        ),
        compiler_params=pltpu.CompilerParams(
            dimension_semantics=("parallel", "parallel", "arbitrary")),
    )(*inputs)
    return out[:M, :Cout]


def _tap_max3(stacked):
    """stacked: (3, total) -> elementwise max over axis 0 via gridded kernel."""
    total = stacked.shape[1]
    LANES, BR = 128, 256
    block = BR * LANES
    padded = round_up(total, block)
    x = jnp.pad(stacked, ((0, 0), (0, padded - total)), constant_values=NEG_BF16)
    R = padded // LANES
    x = x.reshape(3, R, LANES)
    out = pl.pallas_call(
        max3_kernel,
        out_shape=jax.ShapeDtypeStruct((R, LANES), stacked.dtype),
        grid=(R // BR,),
        in_specs=[pl.BlockSpec((3, BR, LANES), lambda i: (0, i, 0))],
        out_specs=pl.BlockSpec((BR, LANES), lambda i: (i, 0)),
        compiler_params=pltpu.CompilerParams(dimension_semantics=("parallel",)),
    )(x)
    return out.reshape(-1)[:total]


def maxpool_3x3_s2_p1(x):
    """Separable 3x3 / stride-2 / pad-1 max pool on NHWC bf16."""
    N, H, W, C = x.shape
    # W pass
    OW = (W + 2 - 3) // 2 + 1
    xp = jnp.pad(x, ((0, 0), (0, 0), (1, 1), (0, 0)), constant_values=NEG_BF16)
    taps = [xp[:, :, j:j + 2 * (OW - 1) + 1:2, :] for j in range(3)]
    y = _tap_max3(jnp.stack(taps, 0).reshape(3, -1)).reshape(N, H, OW, C)
    # H pass
    OH = (H + 2 - 3) // 2 + 1
    yp = jnp.pad(y, ((0, 0), (1, 1), (0, 0), (0, 0)), constant_values=NEG_BF16)
    taps = [yp[:, i:i + 2 * (OH - 1) + 1:2, :, :] for i in range(3)]
    return _tap_max3(jnp.stack(taps, 0).reshape(3, -1)).reshape(N, OH, OW, C)


def conv_bn_forward(x, cp, relu, residual=None, out_dtype=jnp.bfloat16):
    """Conv2d + folded BN (+ReLU) (+fused residual add) on NHWC bf16."""
    N, H, W, C = x.shape
    kh, kw, stride, padding = cp["kh"], cp["kw"], cp["stride"], cp["pad"]
    if kh == 1 and kw == 1 and padding == 0:
        xs = x[:, ::stride, ::stride, :]
        OH, OW = xs.shape[1], xs.shape[2]
        patches = xs.reshape(N * OH * OW, C)
    else:
        xp = jnp.pad(x, ((0, 0), (padding, padding), (padding, padding), (0, 0)))
        Hp, Wp = H + 2 * padding, W + 2 * padding
        OH = (Hp - kh) // stride + 1
        OW = (Wp - kw) // stride + 1
        taps = [xp[:, i:i + stride * (OH - 1) + 1:stride,
                   j:j + stride * (OW - 1) + 1:stride, :]
                for i in range(kh) for j in range(kw)]
        patches = jnp.concatenate(taps, axis=-1).reshape(N * OH * OW, kh * kw * C)

    res2d = (residual.reshape(N * OH * OW, cp["Cout"])
             if residual is not None else None)
    out = matmul_bias_act(patches, cp, relu=relu, residual=res2d,
                          out_dtype=out_dtype)
    return out.reshape(N, OH, OW, cp["Cout"])


# ----------------------------------------------------------------------------
# Deterministic parameter construction (synthetic — no checkpoint load)
# All weight folding / reshaping / padding / bf16 casting happens HERE (hoisted).
# ----------------------------------------------------------------------------
class KeyGen:
    def __init__(self, seed):
        self.key = jax.random.PRNGKey(seed)

    def __call__(self):
        self.key, sub = jax.random.split(self.key)
        return sub


def make_conv(kg, cin, cout, k):
    fan_in = cin * k * k
    return (jax.random.normal(kg(), (cout, cin, k, k), jnp.float32) *
            (2.0 / fan_in) ** 0.5)


def make_bn(kg, c):
    gamma = 1.0 + 0.1 * jax.random.normal(kg(), (c,), jnp.float32)
    beta = 0.1 * jax.random.normal(kg(), (c,), jnp.float32)
    mean = 0.1 * jax.random.normal(kg(), (c,), jnp.float32)
    var = jax.random.uniform(kg(), (c,), jnp.float32, 0.5, 1.5)
    scale = gamma / jnp.sqrt(var + BN_EPS)
    bias = beta - mean * scale
    return scale, bias


def prep_matmul(wmat, scale, bias):
    """Fold per-output scale into weight columns; pad K->128, N->tn; cast bf16."""
    K, N = wmat.shape
    tn = 128 if N <= 128 else 256
    Np = round_up(N, tn)
    Kp = round_up(K, 128)
    wf = wmat * scale[None, :]
    wp = jnp.pad(wf, ((0, Kp - K), (0, Np - N))).astype(jnp.bfloat16)
    bp = jnp.pad(bias, (0, Np - N)).astype(jnp.float32).reshape(1, Np)
    return {"w": wp, "b": bp, "Cout": N, "tn": tn}


def prep_conv_bn(kg, cin, cout, k, stride, padding):
    w = make_conv(kg, cin, cout, k)                     # (Cout, Cin, k, k)
    scale, bias = make_bn(kg, cout)
    wmat = w.transpose(2, 3, 1, 0).reshape(k * k * cin, cout)   # tap-major, C-minor
    d = prep_matmul(wmat, scale, bias)
    d.update(kh=k, kw=k, stride=stride, pad=padding)
    return d


def make_bottleneck(kg, inplanes, planes, stride, downsample):
    p = {
        "conv1": prep_conv_bn(kg, inplanes, planes, 1, 1, 0),
        "conv2": prep_conv_bn(kg, planes, planes, 3, stride, 1),
        "conv3": prep_conv_bn(kg, planes, planes * 4, 1, 1, 0),
    }
    if downsample:
        p["down"] = prep_conv_bn(kg, inplanes, planes * 4, 1, stride, 0)
    return p


def make_layer(kg, inplanes, planes, blocks, stride):
    layer = [make_bottleneck(kg, inplanes, planes, stride, True)]
    for _ in range(blocks - 1):
        layer.append(make_bottleneck(kg, planes * 4, planes, 1, False))
    return layer


def make_resnet50_params(seed=0):
    kg = KeyGen(seed)
    params = {
        "conv1": prep_conv_bn(kg, 3, 64, 7, 2, 3),
        "layer1": make_layer(kg, 64, 64, 3, 1),
        "layer2": make_layer(kg, 256, 128, 4, 2),
        "layer3": make_layer(kg, 512, 256, 6, 2),
        "layer4": make_layer(kg, 1024, 512, 3, 2),
    }
    fc1_w = (jax.random.normal(kg(), (2048, INTERNAL_FEATURES), jnp.float32)
             / 2048.0 ** 0.5)
    fc1_b = 0.01 * jax.random.normal(kg(), (INTERNAL_FEATURES,), jnp.float32)
    fc2_w = (jax.random.normal(kg(), (INTERNAL_FEATURES, CLASSES_CNT), jnp.float32)
             / INTERNAL_FEATURES ** 0.5)
    fc2_b = 0.01 * jax.random.normal(kg(), (CLASSES_CNT,), jnp.float32)
    params["fc1"] = prep_matmul(fc1_w, jnp.ones((INTERNAL_FEATURES,), jnp.float32),
                                fc1_b)
    params["fc2"] = prep_matmul(fc2_w, jnp.ones((CLASSES_CNT,), jnp.float32),
                                fc2_b)
    return params


# ----------------------------------------------------------------------------
# Forward pass (CustomNetwork.forward == resnet50 with replaced fc head)
# ----------------------------------------------------------------------------
def bottleneck_forward(x, p):
    out = conv_bn_forward(x, p["conv1"], relu=True)
    out = conv_bn_forward(out, p["conv2"], relu=True)
    identity = conv_bn_forward(x, p["down"], relu=False) if "down" in p else x
    # residual add + ReLU fused into conv3's matmul epilogue
    return conv_bn_forward(out, p["conv3"], relu=True, residual=identity)


def custom_network_forward(x_nchw, params):
    # NCHW (PyTorch convention) -> NHWC bf16, carried through the backbone.
    x = jnp.transpose(x_nchw, (0, 2, 3, 1)).astype(jnp.bfloat16)
    # stem
    x = conv_bn_forward(x, params["conv1"], relu=True)
    x = maxpool_3x3_s2_p1(x)
    # residual stages
    for name in ("layer1", "layer2", "layer3", "layer4"):
        for blk in params[name]:
            x = bottleneck_forward(x, blk)
    # AdaptiveAvgPool2d(1) -> flatten (small reduction, XLA glue, f32)
    feat = jnp.mean(x.astype(jnp.float32), axis=(1, 2))          # (N, 2048)
    # fc head: Linear(2048,1024) + ReLU + Linear(1024,205); logits in f32
    h = matmul_bias_act(feat, params["fc1"], relu=True)
    logits = matmul_bias_act(h, params["fc2"], relu=False, out_dtype=jnp.float32)
    return logits


def predict(x, params):
    return jnp.argmax(custom_network_forward(x, params), axis=1)


# ----------------------------------------------------------------------------
if __name__ == "__main__":
    params = make_resnet50_params(seed=0)
    # Small input consistent with ResNet-50 (NCHW); 32x32 -> 1x1 at layer4.
    x = jax.random.normal(jax.random.PRNGKey(0), (2, 3, 32, 32), jnp.float32)

    logits = custom_network_forward(x, params)
    logits = jax.block_until_ready(logits)
    assert logits.shape == (2, CLASSES_CNT), logits.shape
    assert bool(jnp.all(jnp.isfinite(logits)))

    preds = jax.block_until_ready(predict(x, params))
    assert preds.shape == (2,)

    print("KERNEL_OK")
</pallas_src>

<mosaic_0001>
module attributes {stable_mosaic.version = 11 : i64} {
  func.func @matmul_kernel(%arg0: i32, %arg1: i32, %arg2: i32, %arg3: memref<256x256xbf16, #tpu.memory_space<vmem>>, %arg4: memref<256x128xbf16, #tpu.memory_space<vmem>>, %arg5: memref<1x128xf32, #tpu.memory_space<vmem>>, %arg6: memref<256x128xbf16, #tpu.memory_space<vmem>>, %arg7: memref<256x128xf32, #tpu.memory_space<vmem>>) attributes {dimension_semantics = [#tpu.dimension_semantics<parallel>, #tpu.dimension_semantics<parallel>, #tpu.dimension_semantics<arbitrary>], iteration_bounds = array<i64: 2, 1, 1>, scalar_prefetch = 0 : i64, scratch_operands = 1 : i64, tpu.core_type = #tpu.core_type<tc>, window_params = [{transform_indices = @transform_0, window_bounds = array<i64: 256, 256>}, {transform_indices = @transform_1, window_bounds = array<i64: 256, 128>}, {transform_indices = @transform_2, window_bounds = array<i64: 1, 128>}, {transform_indices = @transform_3, window_bounds = array<i64: 256, 128>}]} {
    %c0_i32 = arith.constant 0 : i32
    %0 = arith.cmpi eq, %arg2, %c0_i32 : i32
    %1 = arith.extui %0 : i1 to i32
    %c0_i32_0 = arith.constant 0 : i32
    %2 = arith.cmpi ne, %1, %c0_i32_0 : i32
    scf.if %2 {
      %cst_10 = arith.constant 0.000000e+00 : f32
      %12 = vector.broadcast %cst_10 : f32 to vector<256x128xf32>
      %c0_11 = arith.constant 0 : index
      %c0_12 = arith.constant 0 : index
      %13 = vector.load %arg7[%c0_11, %c0_12] : memref<256x128xf32, #tpu.memory_space<vmem>>, vector<256x128xf32>
      tpu.vector_store %arg7[%c0_11, %c0_12], %12 {strides = array<i32>} : memref<256x128xf32, #tpu.memory_space<vmem>>, vector<256x128xf32>,
    } else {
    }
    %c0 = arith.constant 0 : index
    %c0_1 = arith.constant 0 : index
    %3 = vector.load %arg7[%c0, %c0_1] : memref<256x128xf32, #tpu.memory_space<vmem>>, vector<256x128xf32>
    %c0_2 = arith.constant 0 : index
    %c0_3 = arith.constant 0 : index
    %4 = vector.load %arg3[%c0_2, %c0_3] : memref<256x256xbf16, #tpu.memory_space<vmem>>, vector<256x256xbf16>
    %c0_4 = arith.constant 0 : index
    %c0_5 = arith.constant 0 : index
    %5 = vector.load %arg4[%c0_4, %c0_5] : memref<256x128xbf16, #tpu.memory_space<vmem>>, vector<256x128xbf16>
    %cst = arith.constant dense<0.000000e+00> : vector<256x128xf32>
    %6 = tpu.matmul %4, %5, %cst {dimension_numbers = #tpu.dot_dimension_numbers<[1], [0], [0], [1], [0, 0, 1, 1], [], []>} : vector<256x256xbf16>, vector<256x128xbf16>, vector<256x128xf32> -> vector<256x128xf32>
    %7 = arith.addf %3, %6 : vector<256x128xf32>
    %c0_6 = arith.constant 0 : index
    %c0_7 = arith.constant 0 : index
    %8 = vector.load %arg7[%c0_6, %c0_7] : memref<256x128xf32, #tpu.memory_space<vmem>>, vector<256x128xf32>
    tpu.vector_store %arg7[%c0_6, %c0_7], %7 {strides = array<i32>} : memref<256x128xf32, #tpu.memory_space<vmem>>, vector<256x128xf32>,
    %c0_i32_8 = arith.constant 0 : i32
    %9 = arith.cmpi eq, %arg2, %c0_i32_8 : i32
    %10 = arith.extui %9 : i1 to i32
    %c0_i32_9 = arith.constant 0 : i32
    %11 = arith.cmpi ne, %10, %c0_i32_9 : i32
    scf.if %11 {
      %c0_10 = arith.constant 0 : index
      %c0_11 = arith.constant 0 : index
      %12 = vector.load %arg7[%c0_10, %c0_11] : memref<256x128xf32, #tpu.memory_space<vmem>>, vector<256x128xf32>
      %c0_12 = arith.constant 0 : index
      %c0_13 = arith.constant 0 : index
      %13 = vector.load %arg5[%c0_12, %c0_13] : memref<1x128xf32, #tpu.memory_space<vmem>>, vector<1x128xf32>
      %14 = vector.broadcast %13 : vector<1x128xf32> to vector<256x128xf32>
      %15 = arith.addf %12, %14 : vector<256x128xf32>
      %cst_14 = arith.constant 0.000000e+00 : f32
      %16 = vector.broadcast %cst_14 : f32 to vector<256x128xf32>
      %17 = arith.maximumf %15, %16 : vector<256x128xf32>
      %18 = arith.truncf %17 : vector<256x128xf32> to vector<256x128xbf16>
      %c0_15 = arith.constant 0 : index
      %c0_16 = arith.constant 0 : index
      %19 = vector.load %arg6[%c0_15, %c0_16] : memref<256x128xbf16, #tpu.memory_space<vmem>>, vector<256x128xbf16>
      tpu.vector_store %arg6[%c0_15, %c0_16], %18 {strides = array<i32>} : memref<256x128xbf16, #tpu.memory_space<vmem>>, vector<256x128xbf16>,
    } else {
    }
    return
  }
  func.func @transform_0(%arg0: i32, %arg1: i32, %arg2: i32) -> (i32, i32) {
    %c0_i32 = arith.constant 0 : i32
    return %arg0, %arg2 : i32, i32
  }
  func.func @transform_1(%arg0: i32, %arg1: i32, %arg2: i32) -> (i32, i32) {
    %c0_i32 = arith.constant 0 : i32
    return %arg2, %arg1 : i32, i32
  }
  func.func @transform_2(%arg0: i32, %arg1: i32, %arg2: i32) -> (i32, i32) {
    %c0_i32 = arith.constant 0 : i32
    %c0_i32_0 = arith.constant 0 : i32
    return %c0_i32, %arg1 : i32, i32
  }
  func.func @transform_3(%arg0: i32, %arg1: i32, %arg2: i32) -> (i32, i32) {
    %c0_i32 = arith.constant 0 : i32
    return %arg0, %arg1 : i32, i32
  }
}

</mosaic_0001>

<bundles_post_ra>
// kernel: tpu_custom_call.1
= control target key start
LH: loop header
LB: loop body
LE: loop exit
PB: predicated region body
PF: predicated region fallthrough
CT: control target
= control target key end

     0   :  { %8 = vsyncpa [#allocation4], 0  ;;  %s2211_s0 = inlined_call_operand.hbm [shape: bf16[512,256], index: 0, kind: input, shape index: {}]   ;;  %s2212_s1 = inlined_call_operand.hbm [shape: bf16[256,128], index: 1, kind: input, shape index: {}]   ;;  %s2213_s2 = inlined_call_operand.vmem [shape: f32[1,128], index: 2, kind: input, shape index: {}]   ;;  %s2214_s3 = inlined_call_operand.hbm [shape: bf16[512,128], index: 3, kind: output, shape index: {}]  }
   0x1   :  { %10 = vsyncpa [#allocation4 + $0x1], 0 }
   0x2   :  { %11 = vsyncpa [#allocation7], 0 }
   0x3   :  { %12 = vsyncpa [#allocation5], 0 }
   0x4   :  { %14 = vsyncpa [#allocation5 + $0x1], 0  ;;  %s1939_s12 = smov 0   ;;  %s1941_s13 = smov 0  }
   0x5   :  { %s1943_s14 = smov 0   ;;  %s1945_s15 = smov 0  }
   0x6   :  { %s1947_s16 = smov 0   ;;  %s1949_s17 = smov 0  }
   0x7 LB: > { %s1269_s18 = sadd.s32 4294967295, %s1908_s17   ;;  %s1270_s19 = sadd.s32 4294967294, %s1908_s17   ;;  %s1908_s17 = sphi %s1949_s17, %s20_s17   ;;  %s1904_s16 = sphi %s1947_s16, %s2232_s16   ;;  %s1900_s15 = sphi %s1945_s15, %s2231_s15   ;;  %s1896_s14 = sphi %s1943_s14, %s2230_s14   ;;  %s1892_s13 = sphi %s1941_s13, %s2229_s13   ;;  %s1888_s12 = sphi %s1939_s12, %s2228_s12  }
   0x8   : > { %p61_p0 = scmp.ne.s32.totalorder %s1892_s13, %s1888_s12  ;;  %p1973_p1 = scmp.eq.s32.totalorder %s1269_s18, 0 }
   0x9   : > { %p1977_p2 = scmp.eq.s32.totalorder %s1269_s18, 1  ;;  %p147_p3 = scmp.eq.s32.totalorder %s1270_s19, 1 }
   0xa   : > { %p1983_p4 = por %p1973_p1, %p61_p0  ;;  %p1271_p5 = scmp.ge.s32.totalorder %s1908_s17, 1 }
   0xb   : > { %p1988_p6 = por %p147_p3, %p61_p0  ;;  %p154_p7 = scmp.lt.s32.totalorder %s1908_s17, 3 }
   0xc   : > { %s2218_s22 = scalar_select %p1983_p4, 1, 0 }
   0xd   : > { %s2219_s23 = scalar_select %p1988_p6, 1, 0 }
   0xe   : > { %p1993_p8 = pnand %p1271_p5, %p154_p7  ;;  %s1910_s25 = smov [#allocation6]  }
   0xf   : > { %s170_s26 = sshll.u32 %s1910_s25, 4  ;;  %s39_s28 = sadd.s32 1, %s1904_s16  ;;  %s171_s26 = int_to_ptr.vmem [resolvable:$true] %s170_s26 }
  0x10   : > { %p1635_p9 = pneg %p1993_p8  ;;  %s1781_s29 = scalar_lea.vmem %s171_s26, 2048 }
  0x11   : > { %p1782_p13 = scmp.ne.s32.totalorder %s171_s26, %s1781_s29  ;;  %p1789_p5 = scmp.lt.s32.totalorder %s171_s26, %s171_s26 }
  0x12   : > { %p2002_p11 = pnand %p1635_p9, %p1973_p1  ;;  %p1790_p7 = scmp.lt.s32.totalorder %s1781_s29, %s1781_s29 }
  0x14   : > { %p1772_p12 = pneg %p2002_p11  ;;  %p1791_p6 = por %p1790_p7, %p1789_p5 }
  0x16   : > { %p1784_p0 = pnand %p1782_p13, %p1772_p12 }
  0x18   : > { %p1785_p3 = pneg %p1784_p0 }
  0x1a   : > { %p1792_p4 = pnand %p1791_p6, %p1785_p3 }
  0x1c   : > { %1795 = shalt.err (!%p1792_p4)
}
  0x1d   : > { %s1911_s30 = smov 64   ;;  %s1912_s4 = smov 4  }
  0x1e   : > { %1638 = dma.hbm_to_vmem [thread:$0]  (!%p2002_p11), %s2212_s1, 2048, %s171_s26, [#allocation7], %s1911_s30, %s1911_s30, %s1912_s4  }
  0x1f   : > { %p41_p6 = scmp.ge.s32.totalorder %s39_s28, 2  ;;  %s48_s7 = sadd.s32 1, %s1896_s14 }
  0x20   : > { %p55_p4 = scmp.ne.s32.totalorder %s1896_s14, %s1892_s13  ;;  %p56_p9 = scmp.eq.s32.totalorder %s1908_s17, 0 }
  0x21   : > { %s2234_s28 = smov (%p41_p6, %s39_s28), 0  ;;  %p1648_p0 = scmp.lt.s32.totalorder %s1908_s17, 2 }
  0x22   : > { %p2020_p12 = por %p56_p9, %p55_p4  ;;  %p2026_p13 = por %p1977_p2, %p55_p4 }
  0x23   : > { %s43_s10 = ssub.s32 %s1904_s16, %s2234_s28  ;;  %s190_s11 = sand.u32 1, %s1896_s14  }
  0x24   : > { %p46_p11 = scmp.eq.s32.totalorder %s43_s10, 0  ;;  %s1275_s18 = sshll.u32 %s190_s11, 8 }
  0x25   : > { %s1370_s25 = sshll.u32 %s1904_s16, 12  ;;  %s194_s30 = scalar_lea.vmem [#allocation3], %s1275_s18 }
  0x26   : > { %s2035_s19 = scalar_select %p46_p11, %s1896_s14, %s48_s7  }
  0x27   : > { %s203_s29 = scalar_lea.hbm %s2211_s0, %s1370_s25  ;;  %s204_s4 = sshll.u32 %s194_s30, 4  ;;  %s205_s4 = int_to_ptr.vmem [resolvable:$true] %s204_s4 }
  0x28   : > { %p2043_p2 = pnand %p1648_p0, %p2020_p12  ;;  %s191_s5 = scalar_lea.sflag [#allocation4], %s190_s11 }
  0x29   : > { %s1809_s6 = scalar_lea.vmem %s205_s4, 4096  ;;  %s1913_s7 = smov [#allocation3]  }
  0x2a   : > { %p1798_p3 = pneg %p2043_p2  ;;  %p1810_p5 = scmp.ne.s32.totalorder %s205_s4, %s1809_s6 }
  0x2b   : > { %s1814_s10 = sshll.u32 %s1913_s7, 4  ;;  %s1815_s10 = int_to_ptr.vmem [resolvable:$false] %s1814_s10 }
  0x2c   : > { %p1812_p7 = pnand %p1810_p5, %p1798_p3  ;;  %s1816_s25 = scalar_lea.vmem %s1815_s10, 8192 }
  0x2d   : > { %p1817_p4 = scmp.lt.s32.totalorder %s205_s4, %s1815_s10  ;;  %p1818_p9 = scmp.lt.s32.totalorder %s1816_s25, %s1809_s6 }
  0x2e   : > { %p1813_p6 = pneg %p1812_p7 }
  0x2f   : > { %p1819_p11 = por %p1818_p9, %p1817_p4 }
  0x31   : > { %p1820_p10 = pnand %p1819_p11, %p1813_p6 }
  0x33   : > { %1823 = shalt.err (!%p1820_p10)
}
  0x34   : > { %s1914_s8 = smov 128   ;;  %s1915_s18 = smov 8  }
  0x35   : > { %1642 = dma.hbm_to_vmem [thread:$0]  (!%p2043_p2), %s203_s29, 4096, %s205_s4, %s191_s5, %s1914_s8, %s1914_s8, %s1915_s18  }
  0x36   : > { %216 = sbr.rel (%p1993_p8) target bundleno = 372 (0x174), region = 32  ;;  %s2054_s11 = sand.u32 (!%p1993_p8), 1, %s1892_s13  }
  0x37   : > { %s1280_s26 = sshll.u32 (!%p1993_p8), %s2054_s11, 8  ;;  %s219_s27 = scalar_lea.sflag (!%p1993_p8), [#allocation4], %s2054_s11 }
  0x38   : > { %s2058_s30 = scalar_lea.vmem (!%p1993_p8), [#allocation3], %s1280_s26  ;;  %p2225_p12 = scmp.ne.s32.totalorder (!%p1993_p8), %s2218_s22, 0 }
  0x3b   : > { %1875 = dma.done.wait (%p2225_p12), %s219_s27, 4096  }
  0x3c   : > { %1877 = vsyncadd (%p2225_p12), %s219_s27, 4294963200 }
  0x3d   : > { %1879 = dma.done.wait (%p1973_p1), [#allocation7], 2048  }
  0x3e   : > { %1881 = vsyncadd (%p1973_p1), [#allocation7], 4294965248  ;;  %v1706_v0 = vld [vmem:[#allocation6 + $0x78] sm:$0xff]   ;;  %v1708_v2 = vld [vmem:[#allocation6 + $0x70] sm:$0xff]   ;;  %s1282_s24 = sshll.u32 %s2054_s11, 7  ;;  %s1403_s4 = sshll.u32 %s1900_s15, 11 }
  0x3f   : > { %v1707_v1 = vld [vmem:[#allocation6 + $0x38] sm:$0xff]   ;;  %1499 = vmatprep.subr.bf16.mxu0 %v1706_v0  ;;  %1611 = vmatprep.subr.bf16.mxu1 %v1706_v0  ;;  %v1709_v3 = vld [vmem:[#allocation6 + $0x30] sm:$0xff]   ;;  %v1710_v4 = vld [vmem:[#allocation6 + $0x68] sm:$0xff]   ;;  %s2112_s29 = scalar_lea.vmem [#allocation8], %s1282_s24  ;;  %s2159_s7 = scalar_lea.hbm %s2214_s3, %s1403_s4 }
  0x40   : > { %1500 = vmatpush3.bf16.msra.mxu0 %v1707_v1  ;;  %1619 = vmatpush3.bf16.msra.mxu1 %v1707_v1  ;;  %v1711_v5 = vld [vmem:[#allocation6 + $0x28] sm:$0xff]   ;;  %v1712_v6 = vld [vmem:[#allocation6 + $0x60] sm:$0xff]   ;;  %v1714_v8 = vld [vmem:[#allocation6 + $0x58] sm:$0xff]   ;;  %s1154_s21 = sshll.u32 %s2112_s29, 4  ;;  %s1140_s15 = scalar_lea.sflag [#allocation5], %s2054_s11  ;;  %s2161_s21 = int_to_ptr.vmem [resolvable:$true] %s1154_s21 }
  0x41   : > { %1501 = vmatprep.subr.bf16.mxu0 %v1708_v2  ;;  %1612 = vmatprep.subr.bf16.mxu1 %v1708_v2  ;;  %v1713_v7 = vld [vmem:[#allocation6 + $0x20] sm:$0xff]   ;;  %v1715_v9 = vld [vmem:[#allocation6 + $0x18] sm:$0xff]   ;;  %v1716_v10 = vld [vmem:[#allocation6 + $0x50] sm:$0xff]   ;;  %s1824_s10 = scalar_lea.vmem %s2161_s21, 2048  ;;  %s1916_s25 = smov [#allocation8]  }
  0x42   : > { %v1724_v11 = vld [vmem:[%s2058_s30 + $0x4] ss:$8 sps:$4 sm:$0xff]   ;;  %v1717_v13 = vld [vmem:[#allocation6 + $0x10] sm:$0xff]   ;;  %v1722_v18 = vld [vmem:[%s2058_s30] ss:$8 sps:$4 sm:$0xff]   ;;  %p1825_p1 = scmp.ne.s32.totalorder %s2161_s21, %s1824_s10  ;;  %s1828_s8 = sshll.u32 %s1916_s25, 4  ;;  %s1829_s8 = int_to_ptr.vmem [resolvable:$false] %s1828_s8 }
  0x43   : > { %v1727_v12 = vld [vmem:[%s2058_s30 + $0x84] ss:$8 sps:$4 sm:$0xff]   ;;  %680 = vmatprep.mubr.bf16.mxu0 %v1724_v11  ;;  %v1725_v19 = vld [vmem:[%s2058_s30 + $0x80] ss:$8 sps:$4 sm:$0xff]   ;;  %v1728_v20 = vld [vmem:[%s2058_s30 + $0x14] ss:$8 sps:$4 sm:$0xff]   ;;  %p1831_p0 = scmp.lt.s32.totalorder %s2161_s21, %s1829_s8 }
  0x44   : > { %1502 = vmatpush3.bf16.msra.mxu0 %v1709_v3  ;;  %1620 = vmatpush3.bf16.msra.mxu1 %v1709_v3  ;;  %v1718_v14 = vld [vmem:[#allocation6 + $0x48] sm:$0xff]   ;;  %v1720_v16 = vld [vmem:[#allocation6 + $0x40] sm:$0xff]   ;;  %v1730_v21 = vld [vmem:[%s2058_s30 + $0x94] ss:$8 sps:$4 sm:$0xff]   ;;  %p1826_p8 = pnand %p1825_p1, %p2026_p13  ;;  %s1830_s18 = scalar_lea.vmem %s1829_s8, 4096 }
  0x45   : > { %1503 = vmatprep.subr.bf16.mxu0 %v1710_v4  ;;  %1613 = vmatprep.subr.bf16.mxu1 %v1710_v4  ;;  %v1719_v15 = vld [vmem:[#allocation6 + $0x8] sm:$0xff]   ;;  %v1721_v17 = vld [vmem:[#allocation6] sm:$0xff]   ;;  %v1732_v22 = vld [vmem:[%s2058_s30 + $0x10] ss:$8 sps:$4 sm:$0xff]   ;;  %p1832_p2 = scmp.lt.s32.totalorder %s1830_s18, %s1824_s10 }
  0x46   : > { %744 = vmatprep.mubr.bf16.mxu1 %v1727_v12  ;;  %v1733_v23 = vld [vmem:[%s2058_s30 + $0x90] ss:$8 sps:$4 sm:$0xff]   ;;  %v1734_v24 = vld [vmem:[%s2058_s30 + $0x24] ss:$8 sps:$4 sm:$0xff]   ;;  %v1738_v26 = vld [vmem:[%s2058_s30 + $0x20] ss:$8 sps:$4 sm:$0xff]   ;;  %p1827_p10 = pneg %p1826_p8 }
  0x47   : > { %v1736_v25 = vld [vmem:[%s2058_s30 + $0xa4] ss:$8 sps:$4 sm:$0xff]   ;;  %v1739_v27 = vld [vmem:[%s2058_s30 + $0xa0] ss:$8 sps:$4 sm:$0xff]   ;;  %v1740_v28 = vld [vmem:[%s2058_s30 + $0x34] ss:$8 sps:$4 sm:$0xff]   ;;  %p1833_p3 = por %p1832_p2, %p1831_p0 }
  0x48   : > { %1504 = vmatpush3.bf16.msra.mxu0 %v1711_v5  ;;  %1621 = vmatpush3.bf16.msra.mxu1 %v1711_v5  ;;  %v1742_v29 = vld [vmem:[%s2058_s30 + $0xb4] ss:$8 sps:$4 sm:$0xff]   ;;  %v1744_v30 = vld [vmem:[%s2058_s30 + $0x30] ss:$8 sps:$4 sm:$0xff]   ;;  %v1746_v32 = vld [vmem:[%s2058_s30 + $0x44] ss:$8 sps:$4 sm:$0xff]  }
  0x49   : > { %1505 = vmatprep.subr.bf16.mxu0 %v1712_v6  ;;  %1614 = vmatprep.subr.bf16.mxu1 %v1712_v6  ;;  %v1745_v31 = vld [vmem:[%s2058_s30 + $0xb0] ss:$8 sps:$4 sm:$0xff]   ;;  %v1748_v33 = vld [vmem:[%s2058_s30 + $0xc4] ss:$8 sps:$4 sm:$0xff]   ;;  %v1750_v34 = vld [vmem:[%s2058_s30 + $0x40] ss:$8 sps:$4 sm:$0xff]   ;;  %p1834_p5 = pnand %p1833_p3, %p1827_p10 }
  0x4a   : > { %v1751_v35 = vld [vmem:[%s2058_s30 + $0xc0] ss:$8 sps:$4 sm:$0xff]   ;;  %v1752_v36 = vld [vmem:[%s2058_s30 + $0x54] ss:$8 sps:$4 sm:$0xff]   ;;  %v1756_v38 = vld [vmem:[%s2058_s30 + $0x50] ss:$8 sps:$4 sm:$0xff]  }
  0x4b   : > { %v1754_v37 = vld [vmem:[%s2058_s30 + $0xd4] ss:$8 sps:$4 sm:$0xff]   ;;  %v1757_v39 = vld [vmem:[%s2058_s30 + $0xd0] ss:$8 sps:$4 sm:$0xff]   ;;  %v1758_v40 = vld [vmem:[%s2058_s30 + $0x64] ss:$8 sps:$4 sm:$0xff]  }
  0x4c   : > { %1506 = vmatpush3.bf16.msra.mxu0 %v1713_v7  ;;  %1622 = vmatpush3.bf16.msra.mxu1 %v1713_v7  ;;  %v1760_v41 = vld [vmem:[%s2058_s30 + $0xe4] ss:$8 sps:$4 sm:$0xff]   ;;  %v1762_v42 = vld [vmem:[%s2058_s30 + $0x60] ss:$8 sps:$4 sm:$0xff]   ;;  %v1764_v44 = vld [vmem:[%s2058_s30 + $0x74] ss:$8 sps:$4 sm:$0xff]  }
  0x4d   : > { %1507 = vmatprep.subr.bf16.mxu0 %v1714_v8  ;;  %1615 = vmatprep.subr.bf16.mxu1 %v1714_v8  ;;  %v1763_v43 = vld [vmem:[%s2058_s30 + $0xe0] ss:$8 sps:$4 sm:$0xff]   ;;  %v1766_v45 = vld [vmem:[%s2058_s30 + $0xf4] ss:$8 sps:$4 sm:$0xff]   ;;  %v1768_v46 = vld [vmem:[%s2058_s30 + $0x70] ss:$8 sps:$4 sm:$0xff]  }
  0x4e   : > { %v1769_v47 = vld [vmem:[%s2058_s30 + $0xf0] ss:$8 sps:$4 sm:$0xff]   ;;  %v2103_v53 = vld [vmem:[%s2213_s2] ss:$0 sm:$0xff] }
  0x50   : > { %1508 = vmatpush3.bf16.msra.mxu0 %v1715_v9  ;;  %1623 = vmatpush3.bf16.msra.mxu1 %v1715_v9 }
  0x51   : > { %1509 = vmatprep.subr.bf16.mxu0 %v1716_v10  ;;  %1616 = vmatprep.subr.bf16.mxu1 %v1716_v10 }
  0x54   : > { %1510 = vmatpush3.bf16.msra.mxu0 %v1717_v13  ;;  %1624 = vmatpush3.bf16.msra.mxu1 %v1717_v13 }
  0x55   : > { %1511 = vmatprep.subr.bf16.mxu0 %v1718_v14  ;;  %1617 = vmatprep.subr.bf16.mxu1 %v1718_v14 }
  0x58   : > { %1512 = vmatpush3.bf16.msra.mxu0 %v1719_v15  ;;  %1625 = vmatpush3.bf16.msra.mxu1 %v1719_v15 }
  0x59   : > { %1513 = vmatprep.subr.bf16.mxu0 %v1720_v16  ;;  %1618 = vmatprep.subr.bf16.mxu1 %v1720_v16 }
  0x5c   : > { %1514 = vmatpush3.bf16.msra.mxu0 %v1721_v17  ;;  %1626 = vmatpush3.bf16.msra.mxu1 %v1721_v17 }
  0x5f   : > { %681 = vmatmul.mubr.bf16.vlgmr.msra.gmra.mxu0 %v1722_v18  ;;  %745 = vmatmul.mubr.bf16.vlgmr.msra.gmra.mxu1 %v1725_v19 }
  0x60   : > { %688 = vmatprep.mubr.bf16.mxu0 %v1728_v20  ;;  %752 = vmatprep.mubr.bf16.mxu1 %v1730_v21 }
  0x67   : > { %689 = vmatmul.mubr.bf16.gmra.mxu0 %v1732_v22  ;;  %753 = vmatmul.mubr.bf16.gmra.mxu1 %v1733_v23 }
  0x68   : > { %696 = vmatprep.mubr.bf16.mxu0 %v1734_v24  ;;  %760 = vmatprep.mubr.bf16.mxu1 %v1736_v25 }
  0x6f   : > { %697 = vmatmul.mubr.bf16.gmra.mxu0 %v1738_v26  ;;  %761 = vmatmul.mubr.bf16.gmra.mxu1 %v1739_v27 }
  0x70   : > { %704 = vmatprep.mubr.bf16.mxu0 %v1740_v28  ;;  %768 = vmatprep.mubr.bf16.mxu1 %v1742_v29 }
  0x77   : > { %705 = vmatmul.mubr.bf16.gmra.mxu0 %v1744_v30  ;;  %769 = vmatmul.mubr.bf16.gmra.mxu1 %v1745_v31 }
  0x78   : > { %712 = vmatprep.mubr.bf16.mxu0 %v1746_v32  ;;  %776 = vmatprep.mubr.bf16.mxu1 %v1748_v33 }
  0x7f   : > { %713 = vmatmul.mubr.bf16.gmra.mxu0 %v1750_v34  ;;  %777 = vmatmul.mubr.bf16.gmra.mxu1 %v1751_v35 }
  0x80   : > { %720 = vmatprep.mubr.bf16.mxu0 %v1752_v36  ;;  %784 = vmatprep.mubr.bf16.mxu1 %v1754_v37 }
  0x87   : > { %721 = vmatmul.mubr.bf16.gmra.mxu0 %v1756_v38  ;;  %785 = vmatmul.mubr.bf16.gmra.mxu1 %v1757_v39 }
  0x88   : > { %728 = vmatprep.mubr.bf16.mxu0 %v1758_v40  ;;  %792 = vmatprep.mubr.bf16.mxu1 %v1760_v41 }
  0x8f   : > { %729 = vmatmul.mubr.bf16.gmra.mxu0 %v1762_v42  ;;  %793 = vmatmul.mubr.bf16.gmra.mxu1 %v1763_v43 }
  0x90   : > { %736 = vmatprep.mubr.bf16.mxu0 %v1764_v44  ;;  %800 = vmatprep.mubr.bf16.mxu1 %v1766_v45 }
  0x97   : > { %737 = vmatmul.mubr.bf16.gmra.mxu0 %v1768_v46  ;;  %801 = vmatmul.mubr.bf16.gmra.mxu1 %v1769_v47 }
 0x11f   : > { %v1515_v48 = vpop.f32.mrf.mxu0  ;;  %v1563_v49 = vpop.f32.mrf.mxu1 }
 0x121   : > { %v1516_v50 = vpop.f32.mrf.mxu0  ;;  %v1564_v51 = vpop.f32.mrf.mxu1 }
 0x122   : > { %v1517_v52 = vadd.f32 %v1516_v50, %v1515_v48  ;;  %v1565_v54 = vadd.f32 %v1564_v51, %v1563_v49 }
 0x123   : > { %v1518_v55 = vpop.f32.mrf.mxu0  ;;  %v1566_v56 = vpop.f32.mrf.mxu1 }
 0x124   : > { %v915_v57 = vadd.f32 %v1517_v52, %v2103_v53  ;;  %v931_v58 = vadd.f32 %v1565_v54, %v2103_v53 }
 0x125   : > { %v1519_v59 = vpop.f32.mrf.mxu0  ;;  %v1567_v60 = vpop.f32.mrf.mxu1 }
 0x126   : > { %v1520_v61 = vadd.f32 %v1519_v59, %v1518_v55  ;;  %v1568_v62 = vadd.f32 %v1567_v60, %v1566_v56  ;;  %v947_v3 = vmax.f32 %v915_v57, 0.0  ;;  %v963_v4 = vmax.f32 %v931_v58, 0.0 }
 0x127   : > { %v1521_v63 = vpop.f32.mrf.mxu0  ;;  %v1569_v0 = vpop.f32.mrf.mxu1 }
 0x128   : > { %v916_v1 = vadd.f32 %v1520_v61, %v2103_v53  ;;  %v932_v2 = vadd.f32 %v1568_v62, %v2103_v53 }
 0x129   : > { %v1522_v5 = vpop.f32.mrf.mxu0  ;;  %v1570_v6 = vpop.f32.mrf.mxu1 }
 0x12a   : > { %v948_v7 = vmax.f32 %v916_v1, 0.0  ;;  %v964_v8 = vmax.f32 %v932_v2, 0.0  ;;  %v1523_v9 = vadd.f32 %v1522_v5, %v1521_v63  ;;  %v1571_v10 = vadd.f32 %v1570_v6, %v1569_v0 }
 0x12b   : > { %v1524_v11 = vpop.f32.mrf.mxu0  ;;  %v1572_v12 = vpop.f32.mrf.mxu1 }
 0x12c   : > { %v1407_v13 = vpack.c.bf16 %v948_v7, %v947_v3  ;;  %v1447_v14 = vpack.c.bf16 %v964_v8, %v963_v4  ;;  %v917_v15 = vadd.f32 %v1523_v9, %v2103_v53  ;;  %v933_v16 = vadd.f32 %v1571_v10, %v2103_v53 }
 0x12d   : > { %v1525_v17 = vpop.f32.mrf.mxu0  ;;  %v1573_v18 = vpop.f32.mrf.mxu1 }
 0x12e   : > { %1408 = vst [vmem:[%s2112_s29] sm:$0xff] %v1407_v13   ;;  %1491 = vst [vmem:[%s2112_s29 + $0x40] sm:$0xff] %v1447_v14   ;;  %v1526_v19 = vadd.f32 %v1525_v17, %v1524_v11  ;;  %v1574_v20 = vadd.f32 %v1573_v18, %v1572_v12  ;;  %v949_v25 = vmax.f32 %v917_v15, 0.0  ;;  %v965_v26 = vmax.f32 %v933_v16, 0.0 }
 0x12f   : > { %v1527_v21 = vpop.f32.mrf.mxu0  ;;  %v1575_v22 = vpop.f32.mrf.mxu1 }
 0x130   : > { %v918_v23 = vadd.f32 %v1526_v19, %v2103_v53  ;;  %v934_v24 = vadd.f32 %v1574_v20, %v2103_v53 }
 0x131   : > { %v1528_v27 = vpop.f32.mrf.mxu0  ;;  %v1576_v28 = vpop.f32.mrf.mxu1 }
 0x132   : > { %v950_v29 = vmax.f32 %v918_v23, 0.0  ;;  %v966_v30 = vmax.f32 %v934_v24, 0.0  ;;  %v1529_v31 = vadd.f32 %v1528_v27, %v1527_v21  ;;  %v1577_v32 = vadd.f32 %v1576_v28, %v1575_v22 }
 0x133   : > { %v1530_v33 = vpop.f32.mrf.mxu0  ;;  %v1578_v34 = vpop.f32.mrf.mxu1 }
 0x134   : > { %v1412_v35 = vpack.c.bf16 %v950_v29, %v949_v25  ;;  %v1452_v36 = vpack.c.bf16 %v966_v30, %v965_v26  ;;  %v919_v37 = vadd.f32 %v1529_v31, %v2103_v53  ;;  %v935_v38 = vadd.f32 %v1577_v32, %v2103_v53 }
 0x135   : > { %v1531_v39 = vpop.f32.mrf.mxu0  ;;  %v1579_v40 = vpop.f32.mrf.mxu1 }
 0x136   : > { %1484 = vst [vmem:[%s2112_s29 + $0x8] sm:$0xff] %v1412_v35   ;;  %1492 = vst [vmem:[%s2112_s29 + $0x48] sm:$0xff] %v1452_v36   ;;  %v1532_v41 = vadd.f32 %v1531_v39, %v1530_v33  ;;  %v1580_v42 = vadd.f32 %v1579_v40, %v1578_v34  ;;  %v951_v47 = vmax.f32 %v919_v37, 0.0  ;;  %v967_v48 = vmax.f32 %v935_v38, 0.0 }
 0x137   : > { %v1533_v43 = vpop.f32.mrf.mxu0  ;;  %v1581_v44 = vpop.f32.mrf.mxu1 }
 0x138   : > { %v920_v45 = vadd.f32 %v1532_v41, %v2103_v53  ;;  %v936_v46 = vadd.f32 %v1580_v42, %v2103_v53 }
 0x139   : > { %v1534_v49 = vpop.f32.mrf.mxu0  ;;  %v1582_v50 = vpop.f32.mrf.mxu1 }
 0x13a   : > { %v952_v51 = vmax.f32 %v920_v45, 0.0  ;;  %v968_v52 = vmax.f32 %v936_v46, 0.0  ;;  %v1535_v54 = vadd.f32 %v1534_v49, %v1533_v43  ;;  %v1583_v55 = vadd.f32 %v1582_v50, %v1581_v44 }
 0x13b   : > { %v1536_v56 = vpop.f32.mrf.mxu0  ;;  %v1584_v57 = vpop.f32.mrf.mxu1 }
 0x13c   : > { %v1417_v58 = vpack.c.bf16 %v952_v51, %v951_v47  ;;  %v1457_v59 = vpack.c.bf16 %v968_v52, %v967_v48  ;;  %v921_v60 = vadd.f32 %v1535_v54, %v2103_v53  ;;  %v937_v61 = vadd.f32 %v1583_v55, %v2103_v53 }
 0x13d   : > { %v1537_v62 = vpop.f32.mrf.mxu0  ;;  %v1585_v63 = vpop.f32.mrf.mxu1 }
 0x13e   : > { %1485 = vst [vmem:[%s2112_s29 + $0x10] sm:$0xff] %v1417_v58   ;;  %1493 = vst [vmem:[%s2112_s29 + $0x50] sm:$0xff] %v1457_v59   ;;  %v1538_v0 = vadd.f32 %v1537_v62, %v1536_v56  ;;  %v1586_v1 = vadd.f32 %v1585_v63, %v1584_v57  ;;  %v953_v6 = vmax.f32 %v921_v60, 0.0  ;;  %v969_v7 = vmax.f32 %v937_v61, 0.0 }
 0x13f   : > { %v1539_v2 = vpop.f32.mrf.mxu0  ;;  %v1587_v3 = vpop.f32.mrf.mxu1 }
 0x140   : > { %v922_v4 = vadd.f32 %v1538_v0, %v2103_v53  ;;  %v938_v5 = vadd.f32 %v1586_v1, %v2103_v53 }
 0x141   : > { %v1540_v8 = vpop.f32.mrf.mxu0  ;;  %v1588_v9 = vpop.f32.mrf.mxu1 }
 0x142   : > { %v954_v10 = vmax.f32 %v922_v4, 0.0  ;;  %v970_v11 = vmax.f32 %v938_v5, 0.0  ;;  %v1541_v12 = vadd.f32 %v1540_v8, %v1539_v2  ;;  %v1589_v13 = vadd.f32 %v1588_v9, %v1587_v3 }
 0x143   : > { %v1542_v14 = vpop.f32.mrf.mxu0  ;;  %v1590_v15 = vpop.f32.mrf.mxu1 }
 0x144   : > { %v1422_v16 = vpack.c.bf16 %v954_v10, %v953_v6  ;;  %v1462_v17 = vpack.c.bf16 %v970_v11, %v969_v7  ;;  %v923_v18 = vadd.f32 %v1541_v12, %v2103_v53  ;;  %v939_v19 = vadd.f32 %v1589_v13, %v2103_v53 }
 0x145   : > { %v1543_v20 = vpop.f32.mrf.mxu0  ;;  %v1591_v21 = vpop.f32.mrf.mxu1 }
 0x146   : > { %1486 = vst [vmem:[%s2112_s29 + $0x18] sm:$0xff] %v1422_v16   ;;  %1494 = vst [vmem:[%s2112_s29 + $0x58] sm:$0xff] %v1462_v17   ;;  %v1544_v22 = vadd.f32 %v1543_v20, %v1542_v14  ;;  %v1592_v23 = vadd.f32 %v1591_v21, %v1590_v15  ;;  %v955_v28 = vmax.f32 %v923_v18, 0.0  ;;  %v971_v29 = vmax.f32 %v939_v19, 0.0 }
 0x147   : > { %v1545_v24 = vpop.f32.mrf.mxu0  ;;  %v1593_v25 = vpop.f32.mrf.mxu1 }
 0x148   : > { %v924_v26 = vadd.f32 %v1544_v22, %v2103_v53  ;;  %v940_v27 = vadd.f32 %v1592_v23, %v2103_v53 }
 0x149   : > { %v1546_v30 = vpop.f32.mrf.mxu0  ;;  %v1594_v31 = vpop.f32.mrf.mxu1 }
 0x14a   : > { %v956_v32 = vmax.f32 %v924_v26, 0.0  ;;  %v972_v33 = vmax.f32 %v940_v27, 0.0  ;;  %v1547_v34 = vadd.f32 %v1546_v30, %v1545_v24  ;;  %v1595_v35 = vadd.f32 %v1594_v31, %v1593_v25 }
 0x14b   : > { %v1548_v36 = vpop.f32.mrf.mxu0  ;;  %v1596_v37 = vpop.f32.mrf.mxu1 }
 0x14c   : > { %v1427_v38 = vpack.c.bf16 %v956_v32, %v955_v28  ;;  %v1467_v39 = vpack.c.bf16 %v972_v33, %v971_v29  ;;  %v925_v40 = vadd.f32 %v1547_v34, %v2103_v53  ;;  %v941_v41 = vadd.f32 %v1595_v35, %v2103_v53 }
 0x14d   : > { %v1549_v42 = vpop.f32.mrf.mxu0  ;;  %v1597_v43 = vpop.f32.mrf.mxu1 }
 0x14e   : > { %1487 = vst [vmem:[%s2112_s29 + $0x20] sm:$0xff] %v1427_v38   ;;  %1495 = vst [vmem:[%s2112_s29 + $0x60] sm:$0xff] %v1467_v39   ;;  %v1550_v44 = vadd.f32 %v1549_v42, %v1548_v36  ;;  %v1598_v45 = vadd.f32 %v1597_v43, %v1596_v37  ;;  %v957_v50 = vmax.f32 %v925_v40, 0.0  ;;  %v973_v51 = vmax.f32 %v941_v41, 0.0 }
 0x14f   : > { %v1551_v46 = vpop.f32.mrf.mxu0  ;;  %v1599_v47 = vpop.f32.mrf.mxu1 }
 0x150   : > { %v926_v48 = vadd.f32 %v1550_v44, %v2103_v53  ;;  %v942_v49 = vadd.f32 %v1598_v45, %v2103_v53 }
 0x151   : > { %v1552_v52 = vpop.f32.mrf.mxu0  ;;  %v1600_v54 = vpop.f32.mrf.mxu1 }
 0x152   : > { %v958_v55 = vmax.f32 %v926_v48, 0.0  ;;  %v974_v56 = vmax.f32 %v942_v49, 0.0  ;;  %v1553_v57 = vadd.f32 %v1552_v52, %v1551_v46  ;;  %v1601_v58 = vadd.f32 %v1600_v54, %v1599_v47 }
 0x153   : > { %v1554_v59 = vpop.f32.mrf.mxu0  ;;  %v1602_v60 = vpop.f32.mrf.mxu1 }
 0x154   : > { %v1432_v61 = vpack.c.bf16 %v958_v55, %v957_v50  ;;  %v1472_v62 = vpack.c.bf16 %v974_v56, %v973_v51  ;;  %v927_v63 = vadd.f32 %v1553_v57, %v2103_v53  ;;  %v943_v0 = vadd.f32 %v1601_v58, %v2103_v53 }
 0x155   : > { %v1555_v1 = vpop.f32.mrf.mxu0  ;;  %v1603_v2 = vpop.f32.mrf.mxu1 }
 0x156   : > { %1488 = vst [vmem:[%s2112_s29 + $0x28] sm:$0xff] %v1432_v61   ;;  %1496 = vst [vmem:[%s2112_s29 + $0x68] sm:$0xff] %v1472_v62   ;;  %v1556_v3 = vadd.f32 %v1555_v1, %v1554_v59  ;;  %v1604_v4 = vadd.f32 %v1603_v2, %v1602_v60  ;;  %v959_v9 = vmax.f32 %v927_v63, 0.0  ;;  %v975_v10 = vmax.f32 %v943_v0, 0.0 }
 0x157   : > { %v1557_v5 = vpop.f32.mrf.mxu0  ;;  %v1605_v6 = vpop.f32.mrf.mxu1 }
 0x158   : > { %v928_v7 = vadd.f32 %v1556_v3, %v2103_v53  ;;  %v944_v8 = vadd.f32 %v1604_v4, %v2103_v53 }
 0x159   : > { %v1558_v11 = vpop.f32.mrf.mxu0  ;;  %v1606_v12 = vpop.f32.mrf.mxu1 }
 0x15a   : > { %v960_v13 = vmax.f32 %v928_v7, 0.0  ;;  %v976_v14 = vmax.f32 %v944_v8, 0.0  ;;  %v1559_v15 = vadd.f32 %v1558_v11, %v1557_v5  ;;  %v1607_v16 = vadd.f32 %v1606_v12, %v1605_v6 }
 0x15b   : > { %v1560_v17 = vpop.f32.mrf.mxu0  ;;  %v1608_v18 = vpop.f32.mrf.mxu1 }
 0x15c   : > { %v1437_v19 = vpack.c.bf16 %v960_v13, %v959_v9  ;;  %v1477_v20 = vpack.c.bf16 %v976_v14, %v975_v10  ;;  %v929_v23 = vadd.f32 %v1559_v15, %v2103_v53  ;;  %v945_v24 = vadd.f32 %v1607_v16, %v2103_v53 }
 0x15d   : > { %v1561_v21 = vpop.f32.mrf.mxu0  ;;  %v1609_v22 = vpop.f32.mrf.mxu1 }
 0x15e   : > { %1489 = vst [vmem:[%s2112_s29 + $0x30] sm:$0xff] %v1437_v19   ;;  %1497 = vst [vmem:[%s2112_s29 + $0x70] sm:$0xff] %v1477_v20   ;;  %v1562_v25 = vadd.f32 %v1561_v21, %v1560_v17  ;;  %v1610_v26 = vadd.f32 %v1609_v22, %v1608_v18  ;;  %v961_v29 = vmax.f32 %v929_v23, 0.0  ;;  %v977_v30 = vmax.f32 %v945_v24, 0.0 }
 0x160   : > { %v930_v27 = vadd.f32 %v1562_v25, %v2103_v53  ;;  %v946_v28 = vadd.f32 %v1610_v26, %v2103_v53 }
 0x162   : > { %v962_v31 = vmax.f32 %v930_v27, 0.0  ;;  %v978_v32 = vmax.f32 %v946_v28, 0.0 }
 0x164   : > { %v1442_v33 = vpack.c.bf16 %v962_v31, %v961_v29  ;;  %v1482_v34 = vpack.c.bf16 %v978_v32, %v977_v30 }
 0x166   : > { %1490 = vst [vmem:[%s2112_s29 + $0x38] sm:$0xff] %v1442_v33   ;;  %1498 = vst [vmem:[%s2112_s29 + $0x78] sm:$0xff] %v1482_v34  }
 0x167   : > { %1837 = shalt.err (!%p1834_p5)
}
 0x168   : > { %s1838_s26 = scalar_lea.hbm %s2159_s7, 2048  ;;  %s1842_s20 = scalar_lea.hbm %s2214_s3, 4096 }
 0x169   : > { %p1839_p7 = scmp.ne.s32.totalorder %s2159_s7, %s1838_s26  ;;  %p1843_p9 = scmp.lt.s32.totalorder %s2159_s7, %s2214_s3 }
 0x16a   : > { %p1844_p11 = scmp.lt.s32.totalorder %s1842_s20, %s1838_s26 }
 0x16b   : > { %p1840_p6 = pnand %p1839_p7, %p2026_p13 }
 0x16c   : > { %p1845_p12 = por %p1844_p11, %p1843_p9 }
 0x16d   : > { %p1841_p4 = pneg %p1840_p6 }
 0x16f   : > { %p1846_p1 = pnand %p1845_p12, %p1841_p4 }
 0x171   : > { %1849 = shalt.err (!%p1846_p1)
}
 0x172   : > { %s1917_s29 = smov 64   ;;  %s1918_s4 = smov 4  }
 0x173   : > { %1633 = dma.vmem_to_hbm [thread:$0]  (%p2026_p13), %s2161_s21, 2048, %s2159_s7, %s1140_s15, %s1917_s29, %s1917_s29, %s1918_s4  }
 0x174 PF: > { %s1169_s5 = sand.u32 1, %s1888_s12   ;;  %p2226_p8 = scmp.ne.s32.totalorder %s2219_s23, 0 }
 0x175   : > { %p2227_p10 = scmp.ge.s32.totalorder %s1908_s17, 2  ;;  %s1170_s6 = scalar_lea.sflag [#allocation5], %s1169_s5 }
 0x177   : > { %p1644_p0 = pnand %p2227_p10, %p2226_p8 }
 0x179   : > { %p1645_p2 = pneg %p1644_p0 }
 0x17b   : > { %1883 = dma.done.wait (%p1645_p2), %s1170_s6, 2048  }
 0x17c   : > { %1885 = vsyncadd (%p1645_p2), %s1170_s6, 4294965248  ;;  %s20_s17 = sadd.s32 1, %s1908_s17   ;;  %s2228_s12 = smov %s1892_s13 }
 0x17d   : > { %p17_p3 = scmp.ge.s32.totalorder %s20_s17, 4   ;;  %s2229_s13 = smov %s1896_s14 }
 0x17e   : > { %s2230_s14 = smov %s2035_s19  ;;  %s2231_s15 = smov %s1904_s16 }
 0x17f   : > { %s2232_s16 = smov %s2234_s28  ;;  %19 = sbr.rel (!%p17_p3) target bundleno = 7 (0x7), region = 93 }
 0x184   :  { %1175 = vsyncpa [#allocation4], 1 }
 0x185   :  { %1177 = vsyncpa [#allocation4 + $0x1], 1 }
 0x186   :  { %1178 = vsyncpa [#allocation7], 1 }
 0x187   :  { %1179 = vsyncpa [#allocation5], 1 }
 0x188   :  { %1181 = vsyncpa [#allocation5 + $0x1], 1 }

</bundles_post_ra>
